<compile_context>
chip_gen: v7x
topology: tpu7x:2x2x1
jax: 0.10.0
libtpu: 0.0.40
codegen_flags: <defaults>
</compile_context>

<pallas_src>
import jax
import jax.numpy as jnp
from jax.experimental import pallas as pl
from jax.experimental.pallas import tpu as pltpu

_LANE = 128


def _round_up(n, m):
    return ((n + m - 1) // m) * m


def _soft_q_kernel(s_ref, a_ref,
                   w1s_ref, w1a_ref, b1_ref,
                   w2_ref, b2_ref,
                   w3_ref, b3_ref,
                   w4_ref, b4_ref,
                   o_ref):
    """One batch tile through the whole 4-layer MLP (everything in VMEM)."""
    s = s_ref[...].astype(jnp.bfloat16)
    a = a_ref[...].astype(jnp.bfloat16)

    # layer 1: split matmul replaces cat([state, action], 1) @ W1
    h = jnp.dot(s, w1s_ref[...], preferred_element_type=jnp.float32)
    h = h + jnp.dot(a, w1a_ref[...], preferred_element_type=jnp.float32)
    h = jnp.maximum(h + b1_ref[...], 0.0)

    # layer 2
    h = jnp.dot(h.astype(jnp.bfloat16), w2_ref[...],
                preferred_element_type=jnp.float32)
    h = jnp.maximum(h + b2_ref[...], 0.0)

    # layer 3
    h = jnp.dot(h.astype(jnp.bfloat16), w3_ref[...],
                preferred_element_type=jnp.float32)
    h = jnp.maximum(h + b3_ref[...], 0.0)

    # layer 4 (H -> 1): VPU multiply + lane reduction keeps the MXU free and
    # avoids a 1-lane matmul result.
    q = jnp.sum(h * w4_ref[...], axis=-1, keepdims=True) + b4_ref[...]
    o_ref[...] = q.astype(o_ref.dtype)


def prepare_params(params, num_inputs):
    """One-time layout transform of the PyTorch-style parameters.

    Weights become (in, out) bf16, lane-padded to a multiple of 128 on the
    hidden dimension, with W1 split into its state / action row blocks.
    Biases become (1, H_pad) f32.  Padded channels are exactly zero everywhere,
    so the forward pass is numerically unchanged.
    """
    w1, b1, w2, b2, w3, b3, w4, b4 = params
    H = w1.shape[0]
    Hp = _round_up(H, _LANE)
    ph = Hp - H

    w1t = w1.T.astype(jnp.float32)                                   # (d_in, H)
    w1s = jnp.pad(w1t[:num_inputs], ((0, 0), (0, ph))).astype(jnp.bfloat16)
    w1a = jnp.pad(w1t[num_inputs:], ((0, 0), (0, ph))).astype(jnp.bfloat16)
    b1p = jnp.pad(b1, (0, ph)).astype(jnp.float32)[None, :]

    def square(w, b):
        wp = jnp.pad(w.T.astype(jnp.float32), ((0, ph), (0, ph))).astype(jnp.bfloat16)
        bp = jnp.pad(b, (0, ph)).astype(jnp.float32)[None, :]
        return wp, bp

    w2p, b2p = square(w2, b2)
    w3p, b3p = square(w3, b3)

    # Final layer stays f32 (it runs on the VPU, not the MXU).
    w4row = jnp.pad(w4.reshape(1, H).astype(jnp.float32), ((0, 0), (0, ph)))
    b4p = b4.reshape(1, 1).astype(jnp.float32)

    return (w1s, w1a, b1p, w2p, b2p, w3p, b3p, w4row, b4p)


def soft_q_forward(state, action, prepared, *, tile_b=256):
    """state: (B, num_inputs), action: (B, num_actions) -> (B, 1) float32."""
    state = state.astype(jnp.float32)
    action = action.astype(jnp.float32)
    B, num_inputs = state.shape
    num_actions = action.shape[1]

    # Batch tiling: one block when B is small, otherwise 256-row tiles
    # (multiple of 8 sublanes); pad the batch up to a whole number of tiles.
    tile = B if B <= tile_b else tile_b
    n_tiles = pl.cdiv(B, tile)
    Bp = n_tiles * tile
    if Bp != B:
        state = jnp.pad(state, ((0, Bp - B), (0, 0)))
        action = jnp.pad(action, ((0, Bp - B), (0, 0)))

    w1s, w1a, b1, w2, b2, w3, b3, w4, b4 = prepared

    def batch_spec(feat):
        return pl.BlockSpec((tile, feat), lambda i: (i, 0))

    def const_spec(arr):
        return pl.BlockSpec(arr.shape, lambda i: (0, 0))

    out = pl.pallas_call(
        _soft_q_kernel,
        out_shape=jax.ShapeDtypeStruct((Bp, 1), jnp.float32),
        grid=(n_tiles,),
        in_specs=[
            batch_spec(num_inputs),
            batch_spec(num_actions),
            const_spec(w1s), const_spec(w1a), const_spec(b1),
            const_spec(w2), const_spec(b2),
            const_spec(w3), const_spec(b3),
            const_spec(w4), const_spec(b4),
        ],
        out_specs=pl.BlockSpec((tile, 1), lambda i: (i, 0)),
        compiler_params=pltpu.CompilerParams(
            dimension_semantics=("parallel",),
            vmem_limit_bytes=32 * 1024 * 1024,
        ),
    )(state, action, w1s, w1a, b1, w2, b2, w3, b3, w4, b4)

    return out if Bp == B else out[:B]


def init_params(key, num_inputs, num_actions, hidden_size, init_w=0.003):
    """Deterministic init mirroring the PyTorch module's shapes."""
    d_in = num_inputs + num_actions
    ks = jax.random.split(key, 8)

    def lin(kw, kb, fan_in, fan_out):
        bound = 1.0 / jnp.sqrt(jnp.asarray(fan_in, jnp.float32))
        w = jax.random.uniform(kw, (fan_out, fan_in), jnp.float32, -bound, bound)
        b = jax.random.uniform(kb, (fan_out,), jnp.float32, -bound, bound)
        return w, b

    w1, b1 = lin(ks[0], ks[1], d_in, hidden_size)
    w2, b2 = lin(ks[2], ks[3], hidden_size, hidden_size)
    w3, b3 = lin(ks[4], ks[5], hidden_size, hidden_size)
    w4 = jax.random.uniform(ks[6], (1, hidden_size), jnp.float32, -init_w, init_w)
    b4 = jax.random.uniform(ks[7], (1,), jnp.float32, -init_w, init_w)
    return (w1, b1, w2, b2, w3, b3, w4, b4)


def reference_forward(state, action, params):
    """Pure-JAX f32 reference (matches the PyTorch forward)."""
    w1, b1, w2, b2, w3, b3, w4, b4 = params
    x = jnp.concatenate([state, action], axis=1)
    x = jax.nn.relu(x @ w1.T + b1)
    x = jax.nn.relu(x @ w2.T + b2)
    x = jax.nn.relu(x @ w3.T + b3)
    return x @ w4.T + b4


def reference_forward_bf16(state, action, params):
    """Reference using the kernel's precision policy (bf16 in, f32 accumulate)."""
    w1, b1, w2, b2, w3, b3, w4, b4 = params
    bf = lambda t: t.astype(jnp.bfloat16)
    x = jnp.concatenate([state, action], axis=1).astype(jnp.float32)
    h = jax.nn.relu(jnp.dot(bf(x), bf(w1.T), preferred_element_type=jnp.float32) + b1)
    h = jax.nn.relu(jnp.dot(bf(h), bf(w2.T), preferred_element_type=jnp.float32) + b2)
    h = jax.nn.relu(jnp.dot(bf(h), bf(w3.T), preferred_element_type=jnp.float32) + b3)
    return jnp.dot(h, w4.T.astype(jnp.float32)) + b4


if __name__ == "__main__":
    batch = 2
    num_inputs = 8
    num_actions = 4
    hidden_size = 32

    key = jax.random.PRNGKey(0)
    k_state, k_action, k_params, k_big = jax.random.split(key, 4)

    state = jax.random.normal(k_state, (batch, num_inputs), jnp.float32)
    action = jax.random.normal(k_action, (batch, num_actions), jnp.float32)
    params = init_params(k_params, num_inputs, num_actions, hidden_size)
    prepared = prepare_params(params, num_inputs)   # one-time layout transform

    # Small batch (single grid step, block == full array dims).
    q = jax.block_until_ready(soft_q_forward(state, action, prepared))
    assert q.shape == (batch, 1), q.shape
    q_ref16 = reference_forward_bf16(state, action, params)
    q_ref32 = reference_forward(state, action, params)
    assert jnp.allclose(q, q_ref16, atol=1e-3, rtol=1e-3), (q, q_ref16)
    assert jnp.allclose(q, q_ref32, atol=2e-2, rtol=2e-2), (q, q_ref32)

    # Larger batch exercising the batch grid path (256-row tiles, padded batch).
    big = 300
    ks, ka = jax.random.split(k_big)
    state_b = jax.random.normal(ks, (big, num_inputs), jnp.float32)
    action_b = jax.random.normal(ka, (big, num_actions), jnp.float32)
    q_b = jax.block_until_ready(soft_q_forward(state_b, action_b, prepared))
    assert q_b.shape == (big, 1), q_b.shape
    q_b_ref16 = reference_forward_bf16(state_b, action_b, params)
    assert jnp.allclose(q_b, q_b_ref16, atol=1e-3, rtol=1e-3), "batch-grid mismatch"

    print("KERNEL_OK")
</pallas_src>

<mosaic_0001>
module attributes {stable_mosaic.version = 11 : i64} {
  func.func @_soft_q_kernel(%arg0: i32, %arg1: memref<2x8xf32, #tpu.memory_space<vmem>>, %arg2: memref<2x4xf32, #tpu.memory_space<vmem>>, %arg3: memref<8x128xbf16, #tpu.memory_space<vmem>>, %arg4: memref<4x128xbf16, #tpu.memory_space<vmem>>, %arg5: memref<1x128xf32, #tpu.memory_space<vmem>>, %arg6: memref<128x128xbf16, #tpu.memory_space<vmem>>, %arg7: memref<1x128xf32, #tpu.memory_space<vmem>>, %arg8: memref<128x128xbf16, #tpu.memory_space<vmem>>, %arg9: memref<1x128xf32, #tpu.memory_space<vmem>>, %arg10: memref<1x128xf32, #tpu.memory_space<vmem>>, %arg11: memref<1x1xf32, #tpu.memory_space<vmem>>, %arg12: memref<2x1xf32, #tpu.memory_space<vmem>>) attributes {dimension_semantics = [#tpu.dimension_semantics<parallel>], iteration_bounds = array<i64: 1>, scalar_prefetch = 0 : i64, scratch_operands = 0 : i64, tpu.core_type = #tpu.core_type<tc>, window_params = [{transform_indices = @transform_0, window_bounds = array<i64: 2, 8>}, {transform_indices = @transform_1, window_bounds = array<i64: 2, 4>}, {pipeline_mode = #tpu.pipeline_mode<synchronous>, transform_indices = @transform_2, window_bounds = array<i64: 8, 128>}, {pipeline_mode = #tpu.pipeline_mode<synchronous>, transform_indices = @transform_3, window_bounds = array<i64: 4, 128>}, {pipeline_mode = #tpu.pipeline_mode<synchronous>, transform_indices = @transform_4, window_bounds = array<i64: 1, 128>}, {pipeline_mode = #tpu.pipeline_mode<synchronous>, transform_indices = @transform_5, window_bounds = array<i64: 128, 128>}, {pipeline_mode = #tpu.pipeline_mode<synchronous>, transform_indices = @transform_6, window_bounds = array<i64: 1, 128>}, {pipeline_mode = #tpu.pipeline_mode<synchronous>, transform_indices = @transform_7, window_bounds = array<i64: 128, 128>}, {pipeline_mode = #tpu.pipeline_mode<synchronous>, transform_indices = @transform_8, window_bounds = array<i64: 1, 128>}, {pipeline_mode = #tpu.pipeline_mode<synchronous>, transform_indices = @transform_9, window_bounds = array<i64: 1, 128>}, {pipeline_mode = #tpu.pipeline_mode<synchronous>, transform_indices = @transform_10, window_bounds = array<i64: 1, 1>}, {transform_indices = @transform_11, window_bounds = array<i64: 2, 1>}]} {
    %c0 = arith.constant 0 : index
    %c0_0 = arith.constant 0 : index
    %0 = vector.load %arg1[%c0, %c0_0] : memref<2x8xf32, #tpu.memory_space<vmem>>, vector<2x8xf32>
    %1 = arith.truncf %0 : vector<2x8xf32> to vector<2x8xbf16>
    %c0_1 = arith.constant 0 : index
    %c0_2 = arith.constant 0 : index
    %2 = vector.load %arg2[%c0_1, %c0_2] : memref<2x4xf32, #tpu.memory_space<vmem>>, vector<2x4xf32>
    %3 = arith.truncf %2 : vector<2x4xf32> to vector<2x4xbf16>
    %c0_3 = arith.constant 0 : index
    %c0_4 = arith.constant 0 : index
    %4 = vector.load %arg3[%c0_3, %c0_4] : memref<8x128xbf16, #tpu.memory_space<vmem>>, vector<8x128xbf16>
    %cst = arith.constant dense<0.000000e+00> : vector<2x128xf32>
    %5 = tpu.matmul %1, %4, %cst {dimension_numbers = #tpu.dot_dimension_numbers<[1], [0], [0], [1], [0, 0, 1, 1], [], []>} : vector<2x8xbf16>, vector<8x128xbf16>, vector<2x128xf32> -> vector<2x128xf32>
    %c0_5 = arith.constant 0 : index
    %c0_6 = arith.constant 0 : index
    %6 = vector.load %arg4[%c0_5, %c0_6] : memref<4x128xbf16, #tpu.memory_space<vmem>>, vector<4x128xbf16>
    %cst_7 = arith.constant dense<0.000000e+00> : vector<2x128xf32>
    %7 = tpu.matmul %3, %6, %cst_7 {dimension_numbers = #tpu.dot_dimension_numbers<[1], [0], [0], [1], [0, 0, 1, 1], [], []>} : vector<2x4xbf16>, vector<4x128xbf16>, vector<2x128xf32> -> vector<2x128xf32>
    %8 = arith.addf %5, %7 : vector<2x128xf32>
    %c0_8 = arith.constant 0 : index
    %c0_9 = arith.constant 0 : index
    %9 = vector.load %arg5[%c0_8, %c0_9] : memref<1x128xf32, #tpu.memory_space<vmem>>, vector<1x128xf32>
    %10 = vector.broadcast %9 : vector<1x128xf32> to vector<2x128xf32>
    %11 = arith.addf %8, %10 : vector<2x128xf32>
    %cst_10 = arith.constant 0.000000e+00 : f32
    %12 = vector.broadcast %cst_10 : f32 to vector<2x128xf32>
    %13 = arith.maximumf %11, %12 : vector<2x128xf32>
    %14 = arith.truncf %13 : vector<2x128xf32> to vector<2x128xbf16>
    %c0_11 = arith.constant 0 : index
    %c0_12 = arith.constant 0 : index
    %15 = vector.load %arg6[%c0_11, %c0_12] : memref<128x128xbf16, #tpu.memory_space<vmem>>, vector<128x128xbf16>
    %cst_13 = arith.constant dense<0.000000e+00> : vector<2x128xf32>
    %16 = tpu.matmul %14, %15, %cst_13 {dimension_numbers = #tpu.dot_dimension_numbers<[1], [0], [0], [1], [0, 0, 1, 1], [], []>} : vector<2x128xbf16>, vector<128x128xbf16>, vector<2x128xf32> -> vector<2x128xf32>
    %c0_14 = arith.constant 0 : index
    %c0_15 = arith.constant 0 : index
    %17 = vector.load %arg7[%c0_14, %c0_15] : memref<1x128xf32, #tpu.memory_space<vmem>>, vector<1x128xf32>
    %18 = vector.broadcast %17 : vector<1x128xf32> to vector<2x128xf32>
    %19 = arith.addf %16, %18 : vector<2x128xf32>
    %cst_16 = arith.constant 0.000000e+00 : f32
    %20 = vector.broadcast %cst_16 : f32 to vector<2x128xf32>
    %21 = arith.maximumf %19, %20 : vector<2x128xf32>
    %22 = arith.truncf %21 : vector<2x128xf32> to vector<2x128xbf16>
    %c0_17 = arith.constant 0 : index
    %c0_18 = arith.constant 0 : index
    %23 = vector.load %arg8[%c0_17, %c0_18] : memref<128x128xbf16, #tpu.memory_space<vmem>>, vector<128x128xbf16>
    %cst_19 = arith.constant dense<0.000000e+00> : vector<2x128xf32>
    %24 = tpu.matmul %22, %23, %cst_19 {dimension_numbers = #tpu.dot_dimension_numbers<[1], [0], [0], [1], [0, 0, 1, 1], [], []>} : vector<2x128xbf16>, vector<128x128xbf16>, vector<2x128xf32> -> vector<2x128xf32>
    %c0_20 = arith.constant 0 : index
    %c0_21 = arith.constant 0 : index
    %25 = vector.load %arg9[%c0_20, %c0_21] : memref<1x128xf32, #tpu.memory_space<vmem>>, vector<1x128xf32>
    %26 = vector.broadcast %25 : vector<1x128xf32> to vector<2x128xf32>
    %27 = arith.addf %24, %26 : vector<2x128xf32>
    %cst_22 = arith.constant 0.000000e+00 : f32
    %28 = vector.broadcast %cst_22 : f32 to vector<2x128xf32>
    %29 = arith.maximumf %27, %28 : vector<2x128xf32>
    %c0_23 = arith.constant 0 : index
    %c0_24 = arith.constant 0 : index
    %30 = vector.load %arg10[%c0_23, %c0_24] : memref<1x128xf32, #tpu.memory_space<vmem>>, vector<1x128xf32>
    %31 = vector.broadcast %30 : vector<1x128xf32> to vector<2x128xf32>
    %32 = arith.mulf %29, %31 : vector<2x128xf32>
    %cst_25 = arith.constant dense<0.000000e+00> : vector<2xf32>
    %33 = vector.multi_reduction <add>, %32, %cst_25 [1] : vector<2x128xf32> to vector<2xf32>
    %34 = vector.shape_cast %33 : vector<2xf32> to vector<2x1xf32>
    %c0_26 = arith.constant 0 : index
    %c0_27 = arith.constant 0 : index
    %35 = vector.load %arg11[%c0_26, %c0_27] : memref<1x1xf32, #tpu.memory_space<vmem>>, vector<1x1xf32>
    %36 = vector.broadcast %35 : vector<1x1xf32> to vector<2x1xf32>
    %37 = arith.addf %34, %36 : vector<2x1xf32>
    %c0_28 = arith.constant 0 : index
    %c0_29 = arith.constant 0 : index
    %38 = vector.load %arg12[%c0_28, %c0_29] : memref<2x1xf32, #tpu.memory_space<vmem>>, vector<2x1xf32>
    tpu.vector_store %arg12[%c0_28, %c0_29], %37 {strides = array<i32>} : memref<2x1xf32, #tpu.memory_space<vmem>>, vector<2x1xf32>,
    return
  }
  func.func @transform_0(%arg0: i32) -> (i32, i32) {
    %c0_i32 = arith.constant 0 : i32
    %c0_i32_0 = arith.constant 0 : i32
    return %arg0, %c0_i32 : i32, i32
  }
  func.func @transform_1(%arg0: i32) -> (i32, i32) {
    %c0_i32 = arith.constant 0 : i32
    %c0_i32_0 = arith.constant 0 : i32
    return %arg0, %c0_i32 : i32, i32
  }
  func.func @transform_2(%arg0: i32) -> (i32, i32) {
    %c0_i32 = arith.constant 0 : i32
    %c0_i32_0 = arith.constant 0 : i32
    %c0_i32_1 = arith.constant 0 : i32
    return %c0_i32, %c0_i32_0 : i32, i32
  }
  func.func @transform_3(%arg0: i32) -> (i32, i32) {
    %c0_i32 = arith.constant 0 : i32
    %c0_i32_0 = arith.constant 0 : i32
    %c0_i32_1 = arith.constant 0 : i32
    return %c0_i32, %c0_i32_0 : i32, i32
  }
  func.func @transform_4(%arg0: i32) -> (i32, i32) {
    %c0_i32 = arith.constant 0 : i32
    %c0_i32_0 = arith.constant 0 : i32
    %c0_i32_1 = arith.constant 0 : i32
    return %c0_i32, %c0_i32_0 : i32, i32
  }
  func.func @transform_5(%arg0: i32) -> (i32, i32) {
    %c0_i32 = arith.constant 0 : i32
    %c0_i32_0 = arith.constant 0 : i32
    %c0_i32_1 = arith.constant 0 : i32
    return %c0_i32, %c0_i32_0 : i32, i32
  }
  func.func @transform_6(%arg0: i32) -> (i32, i32) {
    %c0_i32 = arith.constant 0 : i32
    %c0_i32_0 = arith.constant 0 : i32
    %c0_i32_1 = arith.constant 0 : i32
    return %c0_i32, %c0_i32_0 : i32, i32
  }
  func.func @transform_7(%arg0: i32) -> (i32, i32) {
    %c0_i32 = arith.constant 0 : i32
    %c0_i32_0 = arith.constant 0 : i32
    %c0_i32_1 = arith.constant 0 : i32
    return %c0_i32, %c0_i32_0 : i32, i32
  }
  func.func @transform_8(%arg0: i32) -> (i32, i32) {
    %c0_i32 = arith.constant 0 : i32
    %c0_i32_0 = arith.constant 0 : i32
    %c0_i32_1 = arith.constant 0 : i32
    return %c0_i32, %c0_i32_0 : i32, i32
  }
  func.func @transform_9(%arg0: i32) -> (i32, i32) {
    %c0_i32 = arith.constant 0 : i32
    %c0_i32_0 = arith.constant 0 : i32
    %c0_i32_1 = arith.constant 0 : i32
    return %c0_i32, %c0_i32_0 : i32, i32
  }
  func.func @transform_10(%arg0: i32) -> (i32, i32) {
    %c0_i32 = arith.constant 0 : i32
    %c0_i32_0 = arith.constant 0 : i32
    %c0_i32_1 = arith.constant 0 : i32
    return %c0_i32, %c0_i32_0 : i32, i32
  }
  func.func @transform_11(%arg0: i32) -> (i32, i32) {
    %c0_i32 = arith.constant 0 : i32
    %c0_i32_0 = arith.constant 0 : i32
    return %arg0, %c0_i32 : i32, i32
  }
}

</mosaic_0001>

<bundles_post_ra>
// kernel: tpu_custom_call.1
= control target key start
LH: loop header
LB: loop body
LE: loop exit
PB: predicated region body
PF: predicated region fallthrough
CT: control target
= control target key end

     0   :  { %s798_s0 = inlined_call_operand.vmem [shape: f32[2,8], index: 0, kind: input, shape index: {}]   ;;  %s799_s1 = inlined_call_operand.hbm [shape: f32[2,4], index: 1, kind: input, shape index: {}]   ;;  %s800_s2 = inlined_call_operand.vmem [shape: bf16[8,128], index: 2, kind: input, shape index: {}]   ;;  %s801_s3 = inlined_call_operand.vmem [shape: bf16[4,128], index: 3, kind: input, shape index: {}]   ;;  %s802_s4 = inlined_call_operand.vmem [shape: f32[1,128], index: 4, kind: input, shape index: {}]   ;;  %s803_s5 = inlined_call_operand.hbm [shape: bf16[128,128], index: 5, kind: input, shape index: {}]   ;;  %s804_s6 = inlined_call_operand.vmem [shape: f32[1,128], index: 6, kind: input, shape index: {}]   ;;  %s805_s7 = inlined_call_operand.hbm [shape: bf16[128,128], index: 7, kind: input, shape index: {}]   ;;  %s806_s8 = inlined_call_operand.vmem [shape: f32[1,128], index: 8, kind: input, shape index: {}]   ;;  %s807_s9 = inlined_call_operand.vmem [shape: f32[1,128], index: 9, kind: input, shape index: {}]   ;;  %s808_s10 = inlined_call_operand.<no memory space> [shape: f32[1,1], index: 10, kind: input, shape index: {}]   ;;  %s809_s11 = inlined_call_operand.vmem [shape: f32[2,1], index: 11, kind: output, shape index: {}]  }
   0x1   :  { %v16_v0 = vstv %s808_s10 }
   0x2   :  { %17 = vst [vmem:[#allocation2] sm:$0x1] %v16_v0 }
   0x3   :  { %18 = vsyncpa [#allocation4], 0 }
   0x4   :  { %19 = vsyncpa [#allocation6], 0  ;;  %s634_s19 = smov [#allocation5]   ;;  %s564_s23 = scalar_lea.hbm %s803_s5, 1024 }
   0x5   :  { %s43_s20 = sshll.u32 %s634_s19, 4  ;;  %p565_p0 = scmp.ne.s32.totalorder %s803_s5, %s564_s23  ;;  %s44_s20 = int_to_ptr.vmem [resolvable:$true] %s43_s20 }
   0x6   :  { %p568_p1 = scmp.lt.u32.totalorder %s564_s23, %s803_s5 }
   0x8   :  { %p570_p2 = pnand %p568_p1, %p565_p0 }
   0xa   :  { %573 = shalt.err (!%p570_p2)
}
   0xb   :  { %s574_s10 = scalar_lea.vmem %s44_s20, 1024  ;;  %p579_p4 = scmp.lt.s32.totalorder %s44_s20, %s44_s20 }
   0xc   :  { %p575_p3 = scmp.ne.s32.totalorder %s44_s20, %s574_s10  ;;  %p580_p5 = scmp.lt.s32.totalorder %s574_s10, %s574_s10 }
   0xe   :  { %p581_p6 = por %p580_p5, %p579_p4 }
  0x10   :  { %p582_p7 = pnand %p581_p6, %p575_p3 }
  0x12   :  { %585 = shalt.err (!%p582_p7)
}
  0x13   :  { %s635_s28 = smov 64   ;;  %s636_s29 = smov 4  }
  0x14   :  { %49 = dma.hbm_to_vmem [thread:$0]  %s803_s5, 1024, %s44_s20, [#allocation6], %s635_s28, %s635_s28, %s636_s29  }
  0x15   :  { %s637_s13 = smov [#allocation3]   ;;  %s638_s15 = smov [#allocation7]  }
  0x16   :  { %s28_s14 = sshll.u32 %s637_s13, 4  ;;  %s57_s16 = sshll.u32 %s638_s15, 4  ;;  %s29_s14 = int_to_ptr.vmem [resolvable:$true] %s28_s14  ;;  %s58_s16 = int_to_ptr.vmem [resolvable:$true] %s57_s16 }
  0x17   :  { %s586_s19 = scalar_lea.hbm %s799_s1, 32 }
  0x18   :  { %p587_p8 = scmp.ne.s32.totalorder %s799_s1, %s586_s19  ;;  %p590_p9 = scmp.lt.u32.totalorder %s586_s19, %s799_s1 }
  0x1a   :  { %p592_p10 = pnand %p590_p9, %p587_p8 }
  0x1c   :  { %595 = shalt.err (!%p592_p10)
}
  0x1d   :  { %s596_s5 = scalar_lea.vmem %s29_s14, 32  ;;  %p601_p12 = scmp.lt.s32.totalorder %s29_s14, %s29_s14 }
  0x1e   :  { %p597_p11 = scmp.ne.s32.totalorder %s29_s14, %s596_s5  ;;  %p602_p13 = scmp.lt.s32.totalorder %s596_s5, %s596_s5 }
  0x20   :  { %p603_p0 = por %p602_p13, %p601_p12 }
  0x22   :  { %p604_p1 = pnand %p603_p0, %p597_p11 }
  0x24   :  { %607 = shalt.err (!%p604_p1)
}
  0x25   :  { %31 = dma.hbm_to_vmem [thread:$0]  %s799_s1, 32, %s29_s14, [#allocation4]  }
  0x26   :  { %s608_s10 = scalar_lea.hbm %s805_s7, 1024 }
  0x27   :  { %p609_p2 = scmp.ne.s32.totalorder %s805_s7, %s608_s10  ;;  %p612_p3 = scmp.lt.u32.totalorder %s608_s10, %s805_s7 }
  0x29   :  { %p614_p4 = pnand %p612_p3, %p609_p2 }
  0x2b   :  { %617 = shalt.err (!%p614_p4)
}
  0x2c   :  { %s618_s17 = scalar_lea.vmem %s58_s16, 1024  ;;  %p623_p6 = scmp.lt.s32.totalorder %s58_s16, %s58_s16 }
  0x2d   :  { %p619_p5 = scmp.ne.s32.totalorder %s58_s16, %s618_s17  ;;  %p624_p7 = scmp.lt.s32.totalorder %s618_s17, %s618_s17 }
  0x2f   :  { %p625_p8 = por %p624_p7, %p623_p6 }
  0x31   :  { %p626_p9 = pnand %p625_p8, %p619_p5 }
  0x33   :  { %629 = shalt.err (!%p626_p9)
}
  0x34   :  { %63 = dma.hbm_to_vmem [thread:$0]  %s805_s7, 1024, %s58_s16, [#allocation6], %s635_s28, %s635_s28, %s636_s29  }
  0x35   :  { %630 = dma.done.wait [#allocation4], 32  }
  0x36   :  { %631 = vsyncadd [#allocation4], 4294967264 }
  0x37   :  { %632 = dma.done.wait [#allocation6], 2048  }
  0x38   :  { %633 = vsyncadd [#allocation6], 4294965248  ;;  %v639_v1 = vmov 0.0   ;;  %vm640_vm0 = vmmov 0   ;;  %vm90_vm1 = vcmask 1041408   ;;  %vm138_vm2 = vcmask 1043456  }
  0x39   :  { %489 = vmatprep.subr.bf16.mxu0 %v639_v1  ;;  %495 = vmatprep.subr.bf16.mxu1 %v639_v1  ;;  %vm86_vm3 = vcmask 31744   ;;  %v85_v2 = vld [vmem:[%s801_s3] sm:$0x3]  ;;  %vm134_vm4 = vcmask 64512   ;;  %v548_v10 = vld [vmem:[#allocation5] sm:$0xff]   ;;  %v549_v11 = vld [vmem:[#allocation5 + $0x8] sm:$0xff]  }
  0x3a   :  { %491 = vmatprep.mubr.msk.bf16.mxu0 %vm640_vm0, %v639_v1  ;;  %497 = vmatprep.mubr.msk.bf16.mxu1 %vm640_vm0, %v639_v1  ;;  %v84_v3 = vld [vmem:[%s800_s2] sm:$0xf]  ;;  %v92_v5 = vsel %vm90_vm1, %v85_v2, 0  ;;  %v550_v12 = vld [vmem:[#allocation5 + $0x10] sm:$0xff]   ;;  %v553_v15 = vld [vmem:[#allocation5 + $0x28] sm:$0xff]   ;;  %vm436_vm5 = vcmask 1024  }
  0x3b   :  { %v82_v4 = vld [vmem:[#allocation3] sm:$0x3]  ;;  %v140_v6 = vsel %vm138_vm2, %v84_v3, 0  ;;  %490 = vmatpush3.bf16.msra.mxu0 %v92_v5  ;;  %v552_v14 = vld [vmem:[#allocation5 + $0x20] sm:$0xff]   ;;  %v554_v16 = vld [vmem:[#allocation5 + $0x30] sm:$0xff]  }
  0x3c   :  { %v83_v7 = vpack.c.bf16 %v82_v4, %v82_v4  ;;  %v80_v8 = vld [vmem:[%s798_s0] sm:$0x3]  ;;  %496 = vmatpush3.bf16.msra.mxu1 %v140_v6  ;;  %501 = vmatprep.subr.bf16.mxu0 %v639_v1  ;;  %v556_v18 = vld [vmem:[#allocation7] sm:$0xff]   ;;  %v557_v19 = vld [vmem:[#allocation7 + $0x8] sm:$0xff]  }
  0x3d   :  { %v81_v9 = vpack.c.bf16 %v80_v8, %v80_v8  ;;  %521 = vmatprep.subr.bf16.mxu1 %v639_v1  ;;  %v551_v13 = vld [vmem:[#allocation5 + $0x18] sm:$0xff]   ;;  %v558_v20 = vld [vmem:[#allocation7 + $0x10] sm:$0xff]   ;;  %v560_v22 = vld [vmem:[#allocation7 + $0x20] sm:$0xff]  }
  0x3e   :  { %492 = vmatmul.mubr.msk.bf16.vlgmr.msra.gmra.mrb[0].mxu0 %vm86_vm3, %v83_v7  ;;  %v555_v17 = vld [vmem:[#allocation5 + $0x38] sm:$0xff]   ;;  %v561_v23 = vld [vmem:[#allocation7 + $0x28] sm:$0xff]   ;;  %v562_v37 = vld [vmem:[#allocation7 + $0x30] sm:$0xff]  }
  0x3f   :  { %498 = vmatmul.mubr.msk.bf16.vlgmr.msra.gmra.mrb[0].mxu1 %vm134_vm4, %v81_v9  ;;  %502 = vmatpush3.bf16.msra.mxu0 %v548_v10  ;;  %v559_v21 = vld [vmem:[#allocation7 + $0x18] sm:$0xff]  }
  0x40   :  { %517 = vmatprep.mubr.msk.bf16.mxu0 %vm640_vm0, %v639_v1  ;;  %503 = vmatprep.subr.bf16.mxu0 %v639_v1  ;;  %v446_v26 = vld [vmem:[%s802_s4] ss:$0 sm:$0xff] }
  0x41   :  { %537 = vmatprep.mubr.msk.bf16.mxu1 %vm640_vm0, %v639_v1  ;;  %522 = vmatpush3.bf16.msra.mxu1 %v556_v18  ;;  %v563_v38 = vld [vmem:[#allocation7 + $0x38] sm:$0xff]  }
  0x42   :  { %523 = vmatprep.subr.bf16.mxu1 %v639_v1  ;;  %v447_v39 = vld [vmem:[%s804_s6] ss:$0 sm:$0xff] }
  0x43   :  { %504 = vmatpush3.bf16.msra.mxu0 %v549_v11  ;;  %v456_v47 = vld [vmem:[%s806_s8] ss:$0 sm:$0xff] }
  0x44   :  { %505 = vmatprep.subr.bf16.mxu0 %v639_v1  ;;  %v465_v52 = vld [vmem:[%s807_s9] ss:$0 sm:$0xff] }
  0x45   :  { %524 = vmatpush3.bf16.msra.mxu1 %v557_v19  ;;  %v466_v57 = vld [vmem:[#allocation2] ss:$0 sm:$0xff] }
  0x46   :  { %525 = vmatprep.subr.bf16.mxu1 %v639_v1 }
  0x47   :  { %506 = vmatpush3.bf16.msra.mxu0 %v550_v12 }
  0x48   :  { %507 = vmatprep.subr.bf16.mxu0 %v639_v1 }
  0x49   :  { %526 = vmatpush3.bf16.msra.mxu1 %v558_v20 }
  0x4a   :  { %527 = vmatprep.subr.bf16.mxu1 %v639_v1 }
  0x4b   :  { %508 = vmatpush3.bf16.msra.mxu0 %v551_v13 }
  0x4c   :  { %509 = vmatprep.subr.bf16.mxu0 %v639_v1 }
  0x4d   :  { %528 = vmatpush3.bf16.msra.mxu1 %v559_v21 }
  0x4e   :  { %529 = vmatprep.subr.bf16.mxu1 %v639_v1 }
  0x4f   :  { %510 = vmatpush3.bf16.msra.mxu0 %v552_v14 }
  0x50   :  { %511 = vmatprep.subr.bf16.mxu0 %v639_v1 }
  0x51   :  { %530 = vmatpush3.bf16.msra.mxu1 %v560_v22 }
  0x52   :  { %531 = vmatprep.subr.bf16.mxu1 %v639_v1 }
  0x53   :  { %512 = vmatpush3.bf16.msra.mxu0 %v553_v15 }
  0x54   :  { %513 = vmatprep.subr.bf16.mxu0 %v639_v1 }
  0x55   :  { %532 = vmatpush3.bf16.msra.mxu1 %v561_v23 }
  0x56   :  { %533 = vmatprep.subr.bf16.mxu1 %v639_v1 }
  0x57   :  { %514 = vmatpush3.bf16.msra.mxu0 %v554_v16 }
  0x58   :  { %515 = vmatprep.subr.bf16.mxu0 %v639_v1 }
  0x59   :  { %534 = vmatpush3.bf16.msra.mxu1 %v562_v37 }
  0x5a   :  { %535 = vmatprep.subr.bf16.mxu1 %v639_v1 }
  0x5b   :  { %516 = vmatpush3.bf16.msra.mxu0 %v555_v17 }
  0x5d   :  { %536 = vmatpush3.bf16.msra.mxu1 %v563_v38 }
 0x111   :  { %v128_v24 = vpop.f32.mrb[0].mxu0 }
 0x112   :  { %v176_v25 = vpop.f32.mrb[0].mxu1  ;;  %v493_v28 = vpop.f32.mrb[1].mxu0 }
 0x113   :  { %v177_v27 = vadd.f32 %v176_v25, %v128_v24  ;;  %v499_v29 = vpop.f32.mrb[1].mxu1  ;;  %v131_v30 = vpop.f32.mrb[2].mxu0 }
 0x114   :  { %v179_v31 = vpop.f32.mrb[2].mxu1  ;;  %v494_v33 = vpop.f32.mrb[3].mxu0 }
 0x115   :  { %v189_v32 = vadd.f32 %v446_v26, %v177_v27  ;;  %v500_v34 = vpop.f32.mrb[3].mxu1 }
 0x117   :  { %v190_v35 = vmax.f32 %v189_v32, 0.0 }
 0x119   :  { %v191_v36 = vpack.c.bf16 %v190_v35, %v190_v35 }
 0x11b   :  { %518 = vmatmul.mubr.bf16.vlgmr.msra.gmra.mrb[4].mxu0 %v191_v36 }
 0x1ee   :  { %v297_v40 = vpop.f32.mrb[4].mxu0 }
 0x1ef   :  { %v298_v41 = vadd.f32 %v447_v39, %v297_v40  ;;  %v519_v42 = vpop.f32.mrb[5].mxu0 }
 0x1f0   :  { %v300_v43 = vpop.f32.mrb[6].mxu0 }
 0x1f1   :  { %v303_v44 = vmax.f32 %v298_v41, 0.0  ;;  %v520_v45 = vpop.f32.mrb[7].mxu0 }
 0x1f3   :  { %v304_v46 = vpack.c.bf16 %v303_v44, %v303_v44 }
 0x1f5   :  { %538 = vmatmul.mubr.bf16.vlgmr.msra.gmra.mrb[4].mxu1 %v304_v46 }
 0x2c8   :  { %v410_v48 = vpop.f32.mrb[4].mxu1 }
 0x2c9   :  { %v411_v49 = vadd.f32 %v456_v47, %v410_v48  ;;  %v539_v50 = vpop.f32.mrb[5].mxu1 }
 0x2ca   :  { %v413_v51 = vpop.f32.mrb[6].mxu1 }
 0x2cb   :  { %v416_v53 = vmax.f32 %v411_v49, 0.0  ;;  %v540_v54 = vpop.f32.mrb[7].mxu1 }
 0x2cd   :  { %v424_v55 = vmul.f32 %v465_v52, %v416_v53 }
 0x2cf   :  { %v425_v56 = vsel %vm90_vm1, %v424_v55, 0.0 }
 0x2d0   :  { %426 = vadd.xlane.f32.xlu0 %v425_v56 }
 0x35d   :  { %v427_v58 = vpop.xlane.xlu0 %426 }
 0x35e   :  { %v435_v59 = vadd.f32 %v466_v57, %v427_v58 }
 0x360   :  { %437 = vst.msk [vmem:[%s809_s11] sm:$0x3] %vm436_vm5, %v435_v59 }
 0x361   :  { %442 = vsyncpa [#allocation4], 1 }
 0x362   :  { %443 = vsyncpa [#allocation6], 1 }

</bundles_post_ra>
